<compile_context>
chip_gen: v6e
topology: v6e:2x2x1
jax: 0.10.0
libtpu: 0.0.40
codegen_flags: <defaults>
</compile_context>

<pallas_src>
import jax
import jax.numpy as jnp
import numpy as np
from jax.experimental import pallas as pl
from jax.experimental.pallas import tpu as pltpu

LAYERS = [128, 128, 128, 64, 16]
INDIM = 50
BN_EPS = 1e-5
N_HIDDEN = len(LAYERS)


def fcn_kernel(x_ref, *refs):
    """One batch tile: 5x (bf16 MXU matmul + f32 bias + ReLU) + lane-dense classify head."""
    out_ref = refs[-1]          # (1, 1, TILE_N) block
    p = refs[:-1]               # 12 resident param refs

    # f32 HBM tile -> bf16 MXU operand; in-kernel cast hides under the MXU slot.
    h = x_ref[...].astype(jnp.bfloat16)                       # (TILE_N, INDIM) bf16
    for i in range(N_HIDDEN):
        w = p[2 * i][...]                                     # (d_in, d_out) bf16 (BN folded in)
        b = p[2 * i + 1][...]                                 # (1, d_out) f32   (BN folded in)
        z = jnp.dot(h, w, preferred_element_type=jnp.float32) + b
        h = jnp.maximum(z, 0.0).astype(jnp.bfloat16)          # ReLU, bf16 for next MXU pass

    wc = p[2 * N_HIDDEN][...]                                 # (1, d_last) bf16
    bc = p[2 * N_HIDDEN + 1][...]                             # (1, 1) f32
    # Classify head as an NT matmul: (1, d_last) x (TILE_N, d_last)^T -> (1, TILE_N),
    # so per-row logits land lane-dense (no 1-of-128-lane masked column stores).
    # TODO(synk): confirm via pl.lower_as_mlir / bundle dump that this lowers to
    # ~tile_n/256 MXU passes and not a (tile_n,16)@(16,1) + transpose relayout.
    logits = jax.lax.dot_general(
        wc, h, dimension_numbers=(((1,), (1,)), ((), ())),
        preferred_element_type=jnp.float32) + bc              # (1, TILE_N)
    out_ref[0] = jax.nn.sigmoid(logits).astype(out_ref.dtype)


def init_params(key):
    """Deterministic params mirroring nn.Linear default init + BatchNorm1d running stats."""
    params = {"hidden": [], "wc": None, "bc": None}
    d_in = INDIM
    for d_out in LAYERS:
        key, kw, kb, kg, kbe, km, kv = jax.random.split(key, 7)
        bound = 1.0 / np.sqrt(d_in)
        w = jax.random.uniform(kw, (d_in, d_out), jnp.float32, -bound, bound)
        b = jax.random.uniform(kb, (1, d_out), jnp.float32, -bound, bound)
        gamma = jax.random.uniform(kg, (1, d_out), jnp.float32, 0.5, 1.5)
        beta = jax.random.uniform(kbe, (1, d_out), jnp.float32, -0.1, 0.1)
        run_mean = jax.random.uniform(km, (1, d_out), jnp.float32, -0.1, 0.1)
        run_var = jax.random.uniform(kv, (1, d_out), jnp.float32, 0.8, 1.2)
        scale = gamma / jnp.sqrt(run_var + BN_EPS)            # BN inference: y = x*scale + shift
        shift = beta - run_mean * scale
        params["hidden"].append((w, b, scale, shift))
        d_in = d_out
    key, kw, kb = jax.random.split(key, 3)
    bound = 1.0 / np.sqrt(d_in)
    params["wc"] = jax.random.uniform(kw, (1, d_in), jnp.float32, -bound, bound)
    params["bc"] = jax.random.uniform(kb, (1, 1), jnp.float32, -bound, bound)
    return params


def fold_params(params):
    """Fold each layer's inference-BN affine into the *following* Linear (exact), cast to bf16.

    relu(x@W_i + b_i)*s_i + t_i feeding Linear_{i+1}  ==  relu(x@W_i + b_i) feeding
    Linear_{i+1} with W' = diag(s_i) @ W_{i+1}, b' = t_i @ W_{i+1} + b_{i+1}.
    The last layer's BN folds into the classify head the same way.
    """
    flat = []
    scale_prev, shift_prev = None, None
    for (w, b, scale, shift) in params["hidden"]:
        if scale_prev is None:
            a, c = w, b
        else:
            a = scale_prev.reshape(-1, 1) * w                 # diag(scale) @ W
            c = shift_prev @ w + b
        flat.append(a.astype(jnp.bfloat16))                   # MXU operand
        flat.append(c.astype(jnp.float32))                    # f32 bias
        scale_prev, shift_prev = scale, shift
    wc = params["wc"] * scale_prev                            # (1, d_last)
    bc = params["bc"] + jnp.sum(params["wc"] * shift_prev, axis=-1, keepdims=True)
    flat.append(wc.astype(jnp.bfloat16))
    flat.append(bc.astype(jnp.float32))
    return flat


def _choose_tile_n(n, tile_n_max):
    """Pick the batch tile: sublane-aligned, capped for v5e's 16 MiB scoped VMEM, and
    an even number of >= 2 tiles when possible so v7x's two TensorCores stay balanced."""
    tile_n_max = max(8, min(int(tile_n_max), 4096))
    num_tiles = pl.cdiv(n, tile_n_max)
    if num_tiles == 1 and n > 8:
        num_tiles = 2                                         # give the 2nd v7x TC work
    if num_tiles > 1 and num_tiles % 2:
        num_tiles += 1                                        # even count -> balanced 2-TC split
    return pl.cdiv(pl.cdiv(n, num_tiles), 8) * 8


def fcn_forward(x, params, *, tile_n=2048):
    """Batch-tiled Pallas forward pass. Returns (n, 1) float32 sigmoid outputs."""
    n = x.shape[0]
    tile_n = _choose_tile_n(n, tile_n)
    num_tiles = pl.cdiv(n, tile_n)
    n_pad = num_tiles * tile_n                                # no jnp.pad: ragged final block
                                                              # handled by Pallas partial reads.
    flat_params = fold_params(params)

    dims = [INDIM] + LAYERS
    flops_per_row = sum(2 * dims[i] * dims[i + 1] for i in range(N_HIDDEN)) + 2 * LAYERS[-1]
    param_bytes = sum(int(p.size) * p.dtype.itemsize for p in flat_params)
    cost = pl.CostEstimate(
        flops=n_pad * flops_per_row,
        transcendentals=2 * n_pad,                            # sigmoid ~ exp + reciprocal
        bytes_accessed=n * INDIM * 4 + param_bytes + n_pad * 4,
    )

    out = pl.pallas_call(
        fcn_kernel,
        out_shape=jax.ShapeDtypeStruct((num_tiles, 1, tile_n), jnp.float32),
        grid=(num_tiles,),
        in_specs=[pl.BlockSpec((tile_n, INDIM), lambda i: (i, 0))]        # x: tiled over batch
        + [pl.BlockSpec(p.shape, lambda i: (0, 0)) for p in flat_params],  # params: resident
        out_specs=pl.BlockSpec((1, 1, tile_n), lambda i: (i, 0, 0)),       # lane-dense logits
        compiler_params=pltpu.CompilerParams(dimension_semantics=("parallel",)),
        cost_estimate=cost,
    )(x, *flat_params)

    # Lane-dense (num_tiles, 1, TILE_N) slab -> (n, 1) column: free layout plumbing.
    return out.reshape(n_pad, 1)[:n]


def fcn_reference(x, params):
    """Pure-JAX f32 reference with the original (unfolded) module semantics."""
    h = x.astype(jnp.float32)
    for (w, b, s, t) in params["hidden"]:
        h = jnp.maximum(h @ w + b, 0.0) * s + t               # Linear -> ReLU -> BN(inference)
    logits = jnp.sum(h * params["wc"], axis=-1, keepdims=True) + params["bc"]
    return jax.nn.sigmoid(logits)


if __name__ == "__main__":
    key = jax.random.PRNGKey(0)
    key, kx1, kx2 = jax.random.split(key, 3)
    params = init_params(key)

    # Small case: single tile, batch already a sublane multiple.
    x_small = jax.random.normal(kx1, (8, INDIM), jnp.float32)
    out_small = jax.block_until_ready(fcn_forward(x_small, params))
    ref_small = jax.block_until_ready(fcn_reference(x_small, params))
    assert out_small.shape == (8, 1), out_small.shape
    # bf16 MXU operands with f32 accumulation -> relaxed tolerance vs the f32 reference.
    np.testing.assert_allclose(np.asarray(out_small), np.asarray(ref_small),
                               atol=2e-2, rtol=2e-2)

    # Multi-tile case: even 2-tile split (504 rows/tile), ragged final block (8 OOB rows
    # read as unspecified, row-independent, sliced off), parallel batch grid, no jnp.pad.
    x_big = jax.random.normal(kx2, (1000, INDIM), jnp.float32)
    out_big = jax.block_until_ready(fcn_forward(x_big, params))
    ref_big = jax.block_until_ready(fcn_reference(x_big, params))
    assert out_big.shape == (1000, 1), out_big.shape
    np.testing.assert_allclose(np.asarray(out_big), np.asarray(ref_big),
                               atol=2e-2, rtol=2e-2)

    print("KERNEL_OK")
</pallas_src>

<mosaic_0001>
module attributes {stable_mosaic.version = 11 : i64} {
  func.func @fcn_kernel(%arg0: i32, %arg1: memref<8x50xf32, #tpu.memory_space<vmem>>, %arg2: memref<50x128xbf16, #tpu.memory_space<vmem>>, %arg3: memref<1x128xf32, #tpu.memory_space<vmem>>, %arg4: memref<128x128xbf16, #tpu.memory_space<vmem>>, %arg5: memref<1x128xf32, #tpu.memory_space<vmem>>, %arg6: memref<128x128xbf16, #tpu.memory_space<vmem>>, %arg7: memref<1x128xf32, #tpu.memory_space<vmem>>, %arg8: memref<128x64xbf16, #tpu.memory_space<vmem>>, %arg9: memref<1x64xf32, #tpu.memory_space<vmem>>, %arg10: memref<64x16xbf16, #tpu.memory_space<vmem>>, %arg11: memref<1x16xf32, #tpu.memory_space<vmem>>, %arg12: memref<1x16xbf16, #tpu.memory_space<vmem>>, %arg13: memref<1x1xf32, #tpu.memory_space<vmem>>, %arg14: memref<1x1x8xf32, #tpu.memory_space<vmem>>) attributes {dimension_semantics = [#tpu.dimension_semantics<parallel>], iteration_bounds = array<i64: 1>, scalar_prefetch = 0 : i64, scratch_operands = 0 : i64, tpu.core_type = #tpu.core_type<tc>, window_params = [{transform_indices = @transform_0, window_bounds = array<i64: 8, 50>}, {pipeline_mode = #tpu.pipeline_mode<synchronous>, transform_indices = @transform_1, window_bounds = array<i64: 50, 128>}, {pipeline_mode = #tpu.pipeline_mode<synchronous>, transform_indices = @transform_2, window_bounds = array<i64: 1, 128>}, {pipeline_mode = #tpu.pipeline_mode<synchronous>, transform_indices = @transform_3, window_bounds = array<i64: 128, 128>}, {pipeline_mode = #tpu.pipeline_mode<synchronous>, transform_indices = @transform_4, window_bounds = array<i64: 1, 128>}, {pipeline_mode = #tpu.pipeline_mode<synchronous>, transform_indices = @transform_5, window_bounds = array<i64: 128, 128>}, {pipeline_mode = #tpu.pipeline_mode<synchronous>, transform_indices = @transform_6, window_bounds = array<i64: 1, 128>}, {pipeline_mode = #tpu.pipeline_mode<synchronous>, transform_indices = @transform_7, window_bounds = array<i64: 128, 64>}, {pipeline_mode = #tpu.pipeline_mode<synchronous>, transform_indices = @transform_8, window_bounds = array<i64: 1, 64>}, {pipeline_mode = #tpu.pipeline_mode<synchronous>, transform_indices = @transform_9, window_bounds = array<i64: 64, 16>}, {pipeline_mode = #tpu.pipeline_mode<synchronous>, transform_indices = @transform_10, window_bounds = array<i64: 1, 16>}, {pipeline_mode = #tpu.pipeline_mode<synchronous>, transform_indices = @transform_11, window_bounds = array<i64: 1, 16>}, {pipeline_mode = #tpu.pipeline_mode<synchronous>, transform_indices = @transform_12, window_bounds = array<i64: 1, 1>}, {transform_indices = @transform_13, window_bounds = array<i64: 1, 1, 8>}]} {
    %c0 = arith.constant 0 : index
    %c0_0 = arith.constant 0 : index
    %0 = vector.load %arg1[%c0, %c0_0] : memref<8x50xf32, #tpu.memory_space<vmem>>, vector<8x50xf32>
    %1 = arith.truncf %0 : vector<8x50xf32> to vector<8x50xbf16>
    %c0_1 = arith.constant 0 : index
    %c0_2 = arith.constant 0 : index
    %2 = vector.load %arg2[%c0_1, %c0_2] : memref<50x128xbf16, #tpu.memory_space<vmem>>, vector<50x128xbf16>
    %c0_3 = arith.constant 0 : index
    %c0_4 = arith.constant 0 : index
    %3 = vector.load %arg3[%c0_3, %c0_4] : memref<1x128xf32, #tpu.memory_space<vmem>>, vector<1x128xf32>
    %cst = arith.constant dense<0.000000e+00> : vector<8x128xf32>
    %4 = tpu.matmul %1, %2, %cst {dimension_numbers = #tpu.dot_dimension_numbers<[1], [0], [0], [1], [0, 0, 1, 1], [], []>} : vector<8x50xbf16>, vector<50x128xbf16>, vector<8x128xf32> -> vector<8x128xf32>
    %5 = vector.broadcast %3 : vector<1x128xf32> to vector<8x128xf32>
    %6 = arith.addf %4, %5 : vector<8x128xf32>
    %cst_5 = arith.constant 0.000000e+00 : f32
    %7 = vector.broadcast %cst_5 : f32 to vector<8x128xf32>
    %8 = arith.maximumf %6, %7 : vector<8x128xf32>
    %9 = arith.truncf %8 : vector<8x128xf32> to vector<8x128xbf16>
    %c0_6 = arith.constant 0 : index
    %c0_7 = arith.constant 0 : index
    %10 = vector.load %arg4[%c0_6, %c0_7] : memref<128x128xbf16, #tpu.memory_space<vmem>>, vector<128x128xbf16>
    %c0_8 = arith.constant 0 : index
    %c0_9 = arith.constant 0 : index
    %11 = vector.load %arg5[%c0_8, %c0_9] : memref<1x128xf32, #tpu.memory_space<vmem>>, vector<1x128xf32>
    %cst_10 = arith.constant dense<0.000000e+00> : vector<8x128xf32>
    %12 = tpu.matmul %9, %10, %cst_10 {dimension_numbers = #tpu.dot_dimension_numbers<[1], [0], [0], [1], [0, 0, 1, 1], [], []>} : vector<8x128xbf16>, vector<128x128xbf16>, vector<8x128xf32> -> vector<8x128xf32>
    %13 = vector.broadcast %11 : vector<1x128xf32> to vector<8x128xf32>
    %14 = arith.addf %12, %13 : vector<8x128xf32>
    %cst_11 = arith.constant 0.000000e+00 : f32
    %15 = vector.broadcast %cst_11 : f32 to vector<8x128xf32>
    %16 = arith.maximumf %14, %15 : vector<8x128xf32>
    %17 = arith.truncf %16 : vector<8x128xf32> to vector<8x128xbf16>
    %c0_12 = arith.constant 0 : index
    %c0_13 = arith.constant 0 : index
    %18 = vector.load %arg6[%c0_12, %c0_13] : memref<128x128xbf16, #tpu.memory_space<vmem>>, vector<128x128xbf16>
    %c0_14 = arith.constant 0 : index
    %c0_15 = arith.constant 0 : index
    %19 = vector.load %arg7[%c0_14, %c0_15] : memref<1x128xf32, #tpu.memory_space<vmem>>, vector<1x128xf32>
    %cst_16 = arith.constant dense<0.000000e+00> : vector<8x128xf32>
    %20 = tpu.matmul %17, %18, %cst_16 {dimension_numbers = #tpu.dot_dimension_numbers<[1], [0], [0], [1], [0, 0, 1, 1], [], []>} : vector<8x128xbf16>, vector<128x128xbf16>, vector<8x128xf32> -> vector<8x128xf32>
    %21 = vector.broadcast %19 : vector<1x128xf32> to vector<8x128xf32>
    %22 = arith.addf %20, %21 : vector<8x128xf32>
    %cst_17 = arith.constant 0.000000e+00 : f32
    %23 = vector.broadcast %cst_17 : f32 to vector<8x128xf32>
    %24 = arith.maximumf %22, %23 : vector<8x128xf32>
    %25 = arith.truncf %24 : vector<8x128xf32> to vector<8x128xbf16>
    %c0_18 = arith.constant 0 : index
    %c0_19 = arith.constant 0 : index
    %26 = vector.load %arg8[%c0_18, %c0_19] : memref<128x64xbf16, #tpu.memory_space<vmem>>, vector<128x64xbf16>
    %c0_20 = arith.constant 0 : index
    %c0_21 = arith.constant 0 : index
    %27 = vector.load %arg9[%c0_20, %c0_21] : memref<1x64xf32, #tpu.memory_space<vmem>>, vector<1x64xf32>
    %cst_22 = arith.constant dense<0.000000e+00> : vector<8x64xf32>
    %28 = tpu.matmul %25, %26, %cst_22 {dimension_numbers = #tpu.dot_dimension_numbers<[1], [0], [0], [1], [0, 0, 1, 1], [], []>} : vector<8x128xbf16>, vector<128x64xbf16>, vector<8x64xf32> -> vector<8x64xf32>
    %29 = vector.broadcast %27 : vector<1x64xf32> to vector<8x64xf32>
    %30 = arith.addf %28, %29 : vector<8x64xf32>
    %cst_23 = arith.constant 0.000000e+00 : f32
    %31 = vector.broadcast %cst_23 : f32 to vector<8x64xf32>
    %32 = arith.maximumf %30, %31 : vector<8x64xf32>
    %33 = arith.truncf %32 : vector<8x64xf32> to vector<8x64xbf16>
    %c0_24 = arith.constant 0 : index
    %c0_25 = arith.constant 0 : index
    %34 = vector.load %arg10[%c0_24, %c0_25] : memref<64x16xbf16, #tpu.memory_space<vmem>>, vector<64x16xbf16>
    %c0_26 = arith.constant 0 : index
    %c0_27 = arith.constant 0 : index
    %35 = vector.load %arg11[%c0_26, %c0_27] : memref<1x16xf32, #tpu.memory_space<vmem>>, vector<1x16xf32>
    %cst_28 = arith.constant dense<0.000000e+00> : vector<8x16xf32>
    %36 = tpu.matmul %33, %34, %cst_28 {dimension_numbers = #tpu.dot_dimension_numbers<[1], [0], [0], [1], [0, 0, 1, 1], [], []>} : vector<8x64xbf16>, vector<64x16xbf16>, vector<8x16xf32> -> vector<8x16xf32>
    %37 = vector.broadcast %35 : vector<1x16xf32> to vector<8x16xf32>
    %38 = arith.addf %36, %37 : vector<8x16xf32>
    %cst_29 = arith.constant 0.000000e+00 : f32
    %39 = vector.broadcast %cst_29 : f32 to vector<8x16xf32>
    %40 = arith.maximumf %38, %39 : vector<8x16xf32>
    %41 = arith.truncf %40 : vector<8x16xf32> to vector<8x16xbf16>
    %c0_30 = arith.constant 0 : index
    %c0_31 = arith.constant 0 : index
    %42 = vector.load %arg12[%c0_30, %c0_31] : memref<1x16xbf16, #tpu.memory_space<vmem>>, vector<1x16xbf16>
    %c0_32 = arith.constant 0 : index
    %c0_33 = arith.constant 0 : index
    %43 = vector.load %arg13[%c0_32, %c0_33] : memref<1x1xf32, #tpu.memory_space<vmem>>, vector<1x1xf32>
    %cst_34 = arith.constant dense<0.000000e+00> : vector<1x8xf32>
    %44 = tpu.matmul %42, %41, %cst_34 {dimension_numbers = #tpu.dot_dimension_numbers<[1], [1], [0], [0], [0, 0, 1, 0], [], []>} : vector<1x16xbf16>, vector<8x16xbf16>, vector<1x8xf32> -> vector<1x8xf32>
    %45 = vector.broadcast %43 : vector<1x1xf32> to vector<1x8xf32>
    %46 = arith.addf %44, %45 : vector<1x8xf32>
    %47 = arith.negf %46 : vector<1x8xf32>
    %48 = math.exp %47 : vector<1x8xf32>
    %cst_35 = arith.constant 1.000000e+00 : f32
    %49 = vector.broadcast %cst_35 : f32 to vector<1x8xf32>
    %50 = arith.addf %49, %48 : vector<1x8xf32>
    %51 = arith.divf %49, %50 : vector<1x8xf32>
    %c0_36 = arith.constant 0 : index
    %c0_37 = arith.constant 0 : index
    %c0_38 = arith.constant 0 : index
    %52 = vector.load %arg14[%c0_36, %c0_37, %c0_38] : memref<1x1x8xf32, #tpu.memory_space<vmem>>, vector<1x1x8xf32>
    %53 = vector.shape_cast %52 : vector<1x1x8xf32> to vector<1x8xf32>
    %54 = vector.shape_cast %51 : vector<1x8xf32> to vector<1x1x8xf32>
    tpu.vector_store %arg14[%c0_36, %c0_37, %c0_38], %54 {strides = array<i32>} : memref<1x1x8xf32, #tpu.memory_space<vmem>>, vector<1x1x8xf32>,
    return
  }
  func.func @transform_0(%arg0: i32) -> (i32, i32) {
    %c0_i32 = arith.constant 0 : i32
    %c0_i32_0 = arith.constant 0 : i32
    return %arg0, %c0_i32 : i32, i32
  }
  func.func @transform_1(%arg0: i32) -> (i32, i32) {
    %c0_i32 = arith.constant 0 : i32
    %c0_i32_0 = arith.constant 0 : i32
    %c0_i32_1 = arith.constant 0 : i32
    return %c0_i32, %c0_i32_0 : i32, i32
  }
  func.func @transform_2(%arg0: i32) -> (i32, i32) {
    %c0_i32 = arith.constant 0 : i32
    %c0_i32_0 = arith.constant 0 : i32
    %c0_i32_1 = arith.constant 0 : i32
    return %c0_i32, %c0_i32_0 : i32, i32
  }
  func.func @transform_3(%arg0: i32) -> (i32, i32) {
    %c0_i32 = arith.constant 0 : i32
    %c0_i32_0 = arith.constant 0 : i32
    %c0_i32_1 = arith.constant 0 : i32
    return %c0_i32, %c0_i32_0 : i32, i32
  }
  func.func @transform_4(%arg0: i32) -> (i32, i32) {
    %c0_i32 = arith.constant 0 : i32
    %c0_i32_0 = arith.constant 0 : i32
    %c0_i32_1 = arith.constant 0 : i32
    return %c0_i32, %c0_i32_0 : i32, i32
  }
  func.func @transform_5(%arg0: i32) -> (i32, i32) {
    %c0_i32 = arith.constant 0 : i32
    %c0_i32_0 = arith.constant 0 : i32
    %c0_i32_1 = arith.constant 0 : i32
    return %c0_i32, %c0_i32_0 : i32, i32
  }
  func.func @transform_6(%arg0: i32) -> (i32, i32) {
    %c0_i32 = arith.constant 0 : i32
    %c0_i32_0 = arith.constant 0 : i32
    %c0_i32_1 = arith.constant 0 : i32
    return %c0_i32, %c0_i32_0 : i32, i32
  }
  func.func @transform_7(%arg0: i32) -> (i32, i32) {
    %c0_i32 = arith.constant 0 : i32
    %c0_i32_0 = arith.constant 0 : i32
    %c0_i32_1 = arith.constant 0 : i32
    return %c0_i32, %c0_i32_0 : i32, i32
  }
  func.func @transform_8(%arg0: i32) -> (i32, i32) {
    %c0_i32 = arith.constant 0 : i32
    %c0_i32_0 = arith.constant 0 : i32
    %c0_i32_1 = arith.constant 0 : i32
    return %c0_i32, %c0_i32_0 : i32, i32
  }
  func.func @transform_9(%arg0: i32) -> (i32, i32) {
    %c0_i32 = arith.constant 0 : i32
    %c0_i32_0 = arith.constant 0 : i32
    %c0_i32_1 = arith.constant 0 : i32
    return %c0_i32, %c0_i32_0 : i32, i32
  }
  func.func @transform_10(%arg0: i32) -> (i32, i32) {
    %c0_i32 = arith.constant 0 : i32
    %c0_i32_0 = arith.constant 0 : i32
    %c0_i32_1 = arith.constant 0 : i32
    return %c0_i32, %c0_i32_0 : i32, i32
  }
  func.func @transform_11(%arg0: i32) -> (i32, i32) {
    %c0_i32 = arith.constant 0 : i32
    %c0_i32_0 = arith.constant 0 : i32
    %c0_i32_1 = arith.constant 0 : i32
    return %c0_i32, %c0_i32_0 : i32, i32
  }
  func.func @transform_12(%arg0: i32) -> (i32, i32) {
    %c0_i32 = arith.constant 0 : i32
    %c0_i32_0 = arith.constant 0 : i32
    %c0_i32_1 = arith.constant 0 : i32
    return %c0_i32, %c0_i32_0 : i32, i32
  }
  func.func @transform_13(%arg0: i32) -> (i32, i32, i32) {
    %c0_i32 = arith.constant 0 : i32
    %c0_i32_0 = arith.constant 0 : i32
    %c0_i32_1 = arith.constant 0 : i32
    return %arg0, %c0_i32, %c0_i32_0 : i32, i32, i32
  }
}

</mosaic_0001>

<bundles_post_ra>
// kernel: tpu_custom_call.1
= control target key start
LH: loop header
LB: loop body
LE: loop exit
PB: predicated region body
PF: predicated region fallthrough
CT: control target
= control target key end

     0   :  { %s1148_s0 = inlined_call_operand.vmem [shape: f32[8,50], index: 0, kind: input, shape index: {}]   ;;  %s1149_s1 = inlined_call_operand.hbm [shape: bf16[50,128], index: 1, kind: input, shape index: {}]   ;;  %s1150_s2 = inlined_call_operand.vmem [shape: f32[1,128], index: 2, kind: input, shape index: {}]   ;;  %s1151_s3 = inlined_call_operand.vmem [shape: bf16[128,128], index: 3, kind: input, shape index: {}]   ;;  %s1152_s4 = inlined_call_operand.vmem [shape: f32[1,128], index: 4, kind: input, shape index: {}]   ;;  %s1153_s5 = inlined_call_operand.vmem [shape: bf16[128,128], index: 5, kind: input, shape index: {}]   ;;  %s1154_s6 = inlined_call_operand.vmem [shape: f32[1,128], index: 6, kind: input, shape index: {}]   ;;  %s1155_s7 = inlined_call_operand.vmem [shape: bf16[128,64], index: 7, kind: input, shape index: {}]   ;;  %s1156_s8 = inlined_call_operand.vmem [shape: f32[1,64], index: 8, kind: input, shape index: {}]   ;;  %s1157_s9 = inlined_call_operand.vmem [shape: bf16[64,16], index: 9, kind: input, shape index: {}]   ;;  %s1158_s10 = inlined_call_operand.vmem [shape: f32[1,16], index: 10, kind: input, shape index: {}]   ;;  %s1159_s11 = inlined_call_operand.vmem [shape: bf16[1,16], index: 11, kind: input, shape index: {}]   ;;  %s1160_s12 = inlined_call_operand.<no memory space> [shape: f32[1,1], index: 12, kind: input, shape index: {}]   ;;  %s1161_s13 = inlined_call_operand.hbm [shape: f32[1,1,8], index: 13, kind: output, shape index: {}]  }
   0x1   :  { %v18_v0 = vstv %s1160_s12 }
   0x2   :  { %19 = vst [vmem:[#allocation2] sm:$0x1] %v18_v0 }
   0x3   :  { %20 = vsyncpa [#allocation4], 0 }
   0x4   :  { %21 = vsyncpa [#allocation5], 0  ;;  %s912_s27 = smov [#allocation3]  }
   0x5   :  { %s29_s28 = sshll.u32 %s912_s27, 4  ;;  %s30_s28 = int_to_ptr.vmem [resolvable:$true] %s29_s28 }
   0x6   :  { %s876_s29 = scalar_lea.vmem %s30_s28, 448  ;;  %p881_p1 = scmp.lt.s32.totalorder %s30_s28, %s30_s28 }
   0x7   :  { %p877_p0 = scmp.ne.s32.totalorder %s30_s28, %s876_s29  ;;  %p882_p2 = scmp.lt.s32.totalorder %s876_s29, %s876_s29 }
   0x9   :  { %p883_p3 = por %p882_p2, %p881_p1 }
   0xb   :  { %p884_p4 = pnand %p883_p3, %p877_p0 }
   0xd   :  { %887 = shalt.err (!%p884_p4)
}
   0xe   :  { %s913_s30 = smov 64   ;;  %s914_s14 = smov 4  }
   0xf   :  { %35 = dma.hbm_to_vmem [thread:$0]  %s1149_s1, 448, %s30_s28, [#allocation4], %s913_s30, %s913_s30, %s914_s14  }
  0x10   :  { %908 = dma.done.wait [#allocation4], 448  }
  0x11   :  { %909 = vsyncadd [#allocation4], 4294966848  ;;  %v915_v1 = vmov 0.0   ;;  %vm916_vm0 = vmmov 0   ;;  %vm103_vm1 = vcmask 1040384   ;;  %v833_v4 = vld [vmem:[#allocation3 + $0x10] sm:$0xff]  }
  0x12   :  { %734 = vmatprep.subr.bf16.mxu0 %v915_v1  ;;  %742 = vmatprep.mubr.msk.bf16.mxu0 %vm916_vm0, %v915_v1  ;;  %v832_v2 = vld [vmem:[#allocation3 + $0x18] ss:$0 sps:$4 sm:$0x11]   ;;  %v837_v6 = vld [vmem:[%s1151_s3 + $0x30] sm:$0xff]   ;;  %v835_v8 = vld [vmem:[#allocation3] sm:$0xff]   ;;  %vm99_vm2 = vcmask 408576  }
  0x13   :  { %746 = vmatprep.subr.bf16.mxu1 %v915_v1  ;;  %762 = vmatprep.mubr.msk.bf16.mxu1 %vm916_vm0, %v915_v1  ;;  %v105_v3 = vsel %vm103_vm1, %v832_v2, 0  ;;  %v836_v5 = vld [vmem:[%s1151_s3 + $0x38] sm:$0xff]   ;;  %v834_v7 = vld [vmem:[#allocation3 + $0x8] sm:$0xff]   ;;  %v62_v9 = vld [vmem:[%s1148_s0] sm:$0xff]  ;;  %vm527_vm3 = vcmask 523264   ;;  %vm584_vm4 = vcmask 130048  }
  0x14   :  { %735 = vmatpush3.bf16.msra.mxu0 %v105_v3  ;;  %747 = vmatpush3.bf16.msra.mxu1 %v836_v5  ;;  %v838_v10 = vld [vmem:[%s1151_s3 + $0x28] sm:$0xff]   ;;  %v839_v11 = vld [vmem:[%s1151_s3 + $0x20] sm:$0xff]   ;;  %v63_v12 = vpack.c.bf16 %v62_v9, %v62_v9  ;;  %v840_v13 = vld [vmem:[%s1151_s3 + $0x18] sm:$0xff]   ;;  %vm637_vm5 = vcmask 57344  }
  0x15   :  { %736 = vmatprep.subr.bf16.mxu0 %v915_v1  ;;  %748 = vmatprep.subr.bf16.mxu1 %v915_v1  ;;  %v841_v14 = vld [vmem:[%s1151_s3 + $0x10] sm:$0xff]   ;;  %v842_v15 = vld [vmem:[%s1151_s3 + $0x8] sm:$0xff]   ;;  %v843_v16 = vld [vmem:[%s1151_s3] sm:$0xff]  }
  0x16   :  { %v844_v17 = vld [vmem:[%s1153_s5 + $0x38] sm:$0xff]   ;;  %v845_v18 = vld [vmem:[%s1153_s5 + $0x30] sm:$0xff]   ;;  %v846_v19 = vld [vmem:[%s1153_s5 + $0x28] sm:$0xff]  }
  0x17   :  { %v847_v20 = vld [vmem:[%s1153_s5 + $0x20] sm:$0xff]   ;;  %v848_v21 = vld [vmem:[%s1153_s5 + $0x18] sm:$0xff]   ;;  %v849_v22 = vld [vmem:[%s1153_s5 + $0x10] sm:$0xff]  }
  0x18   :  { %737 = vmatpush3.bf16.msra.mxu0 %v833_v4  ;;  %749 = vmatpush3.bf16.msra.mxu1 %v837_v6  ;;  %v654_v23 = vld [vmem:[%s1150_s2] ss:$0 sm:$0xff]  ;;  %v850_v31 = vld [vmem:[%s1153_s5 + $0x8] sm:$0xff]   ;;  %v852_v33 = vld [vmem:[%s1155_s7 + $0x38] sm:$0xff]  }
  0x19   :  { %738 = vmatprep.subr.bf16.mxu0 %v915_v1  ;;  %750 = vmatprep.subr.bf16.mxu1 %v915_v1  ;;  %v851_v32 = vld [vmem:[%s1153_s5] sm:$0xff]   ;;  %v853_v34 = vld [vmem:[%s1155_s7 + $0x30] sm:$0xff]   ;;  %v854_v35 = vld [vmem:[%s1155_s7 + $0x28] sm:$0xff]  }
  0x1a   :  { %v855_v36 = vld [vmem:[%s1155_s7 + $0x20] sm:$0xff]   ;;  %v856_v37 = vld [vmem:[%s1155_s7 + $0x18] sm:$0xff]   ;;  %v857_v38 = vld [vmem:[%s1155_s7 + $0x10] sm:$0xff]  }
  0x1b   :  { %v660_v39 = vld [vmem:[%s1152_s4] ss:$0 sm:$0xff]  ;;  %v858_v47 = vld [vmem:[%s1155_s7 + $0x8] sm:$0xff]   ;;  %v860_v49 = vld [vmem:[%s1157_s9 + $0x18] sm:$0xff]  }
  0x1c   :  { %739 = vmatpush3.bf16.msra.mxu0 %v834_v7  ;;  %751 = vmatpush3.bf16.msra.mxu1 %v838_v10  ;;  %v859_v48 = vld [vmem:[%s1155_s7] sm:$0xff]   ;;  %v861_v50 = vld [vmem:[%s1157_s9 + $0x10] sm:$0xff]   ;;  %v862_v59 = vld [vmem:[%s1157_s9 + $0x8] sm:$0xff]   ;;  %v917_v7 = vmov 0  }
  0x1d   :  { %740 = vmatprep.subr.bf16.mxu0 %v915_v1  ;;  %752 = vmatprep.subr.bf16.mxu1 %v915_v1  ;;  %v669_v51 = vld [vmem:[%s1154_s6] ss:$0 sm:$0xff] }
  0x1e   :  { %v863_v60 = vld [vmem:[%s1157_s9] sm:$0xff]   ;;  %831 = vset.pattern.permute.xlu0 %v917_v7 }
  0x1f   :  { %v678_v61 = vld [vmem:[%s1156_s8] ss:$0 sm:$0xff] }
  0x20   :  { %741 = vmatpush3.bf16.msra.mxu0 %v835_v8  ;;  %753 = vmatpush3.bf16.msra.mxu1 %v839_v11  ;;  %v574_v6 = vld [vmem:[#allocation2] sm:$0x1] }
  0x21   :  { %766 = vmatprep.subr.bf16.mxu0 %v915_v1  ;;  %754 = vmatprep.subr.bf16.mxu1 %v915_v1  ;;  %v687_v8 = vld [vmem:[%s1158_s10] ss:$0 sm:$0xff]  ;;  %s918_s10 = smov [#allocation6]  }
  0x22   :  { %577 = vperm.xlu0 %831, %v574_v6   ;;  %s645_s5 = sshll.u32 %s918_s10, 4  ;;  %s646_s5 = int_to_ptr.vmem [resolvable:$true] %s645_s5 }
  0x23   :  { %743 = vmatmul.mubr.msk.bf16.vlgmr.msra.gmra.mxu0 %vm99_vm2, %v63_v12  ;;  %s892_s1 = scalar_lea.vmem %s646_s5, 32  ;;  %p893_p6 = scmp.lt.s32.totalorder %s646_s5, %s646_s5 }
  0x24   :  { %782 = vmatprep.mubr.msk.bf16.mxu0 %vm916_vm0, %v915_v1  ;;  %755 = vmatpush3.bf16.msra.mxu1 %v840_v13 }
  0x25   :  { %756 = vmatprep.subr.bf16.mxu1 %v915_v1  ;;  %767 = vmatpush3.bf16.msra.mxu0 %v844_v17  ;;  %v580_v17 = vlaneseq }
  0x26   :  { %768 = vmatprep.subr.bf16.mxu0 %v915_v1 }
  0x28   :  { %757 = vmatpush3.bf16.msra.mxu1 %v841_v14 }
  0x29   :  { %758 = vmatprep.subr.bf16.mxu1 %v915_v1  ;;  %769 = vmatpush3.bf16.msra.mxu0 %v845_v18  ;;  %v581_v18 = vshrl.u32 %v580_v17, 7 }
  0x2a   :  { %770 = vmatprep.subr.bf16.mxu0 %v915_v1 }
  0x2c   :  { %759 = vmatpush3.bf16.msra.mxu1 %v842_v15 }
  0x2d   :  { %760 = vmatprep.subr.bf16.mxu1 %v915_v1  ;;  %771 = vmatpush3.bf16.msra.mxu0 %v846_v19  ;;  %v582_v19 = vsub.s32 0, %v581_v18 }
  0x2e   :  { %772 = vmatprep.subr.bf16.mxu0 %v915_v1 }
  0x30   :  { %761 = vmatpush3.bf16.msra.mxu1 %v843_v16 }
  0x31   :  { %786 = vmatprep.subr.bf16.mxu1 %v915_v1  ;;  %773 = vmatpush3.bf16.msra.mxu0 %v847_v20 }
  0x32   :  { %774 = vmatprep.subr.bf16.mxu0 %v915_v1 }
  0x35   :  { %775 = vmatpush3.bf16.msra.mxu0 %v848_v21 }
  0x36   :  { %776 = vmatprep.subr.bf16.mxu0 %v915_v1 }
  0x39   :  { %777 = vmatpush3.bf16.msra.mxu0 %v849_v22 }
  0x3a   :  { %778 = vmatprep.subr.bf16.mxu0 %v915_v1 }
  0x3d   :  { %779 = vmatpush3.bf16.msra.mxu0 %v850_v31 }
  0x3e   :  { %780 = vmatprep.subr.bf16.mxu0 %v915_v1 }
  0x41   :  { %781 = vmatpush3.bf16.msra.mxu0 %v851_v32 }
  0x42   :  { %806 = vmatprep.subr.bf16.mxu0 %v915_v1 }
  0x9d   :  { %v578_v20 = vpop.permute.xlu0 %577 }
  0x9e   :  { %v583_v21 = vrot.slane %v578_v20, %v582_v19 }
  0xe3   :  { %v141_v24 = vpop.f32.mrf.mxu0 }
  0xe4   :  { %v142_v25 = vadd.f32 %v654_v23, %v141_v24 }
  0xe5   :  { %v744_v26 = vpop.f32.mrf.mxu0 }
  0xe6   :  { %v147_v27 = vmax.f32 %v142_v25, 0.0 }
  0xe7   :  { %v144_v28 = vpop.f32.mrf.mxu0 }
  0xe8   :  { %v148_v29 = vpack.c.bf16 %v147_v27, %v147_v27 }
  0xe9   :  { %v745_v30 = vpop.f32.mrf.mxu0 }
  0xea   :  { %763 = vmatmul.mubr.bf16.vlgmr.msra.gmra.mxu1 %v148_v29 }
  0xeb   :  { %802 = vmatprep.mubr.msk.bf16.mxu1 %vm916_vm0, %v915_v1  ;;  %787 = vmatpush3.bf16.msra.mxu1 %v852_v33 }
  0xec   :  { %788 = vmatprep.subr.bf16.mxu1 %v915_v1 }
  0xef   :  { %789 = vmatpush3.bf16.msra.mxu1 %v853_v34 }
  0xf0   :  { %790 = vmatprep.subr.bf16.mxu1 %v915_v1 }
  0xf3   :  { %791 = vmatpush3.bf16.msra.mxu1 %v854_v35 }
  0xf4   :  { %792 = vmatprep.subr.bf16.mxu1 %v915_v1 }
  0xf7   :  { %793 = vmatpush3.bf16.msra.mxu1 %v855_v36 }
  0xf8   :  { %794 = vmatprep.subr.bf16.mxu1 %v915_v1 }
  0xfb   :  { %795 = vmatpush3.bf16.msra.mxu1 %v856_v37 }
  0xfc   :  { %796 = vmatprep.subr.bf16.mxu1 %v915_v1 }
  0xff   :  { %797 = vmatpush3.bf16.msra.mxu1 %v857_v38 }
 0x100   :  { %798 = vmatprep.subr.bf16.mxu1 %v915_v1 }
 0x103   :  { %799 = vmatpush3.bf16.msra.mxu1 %v858_v47 }
 0x104   :  { %800 = vmatprep.subr.bf16.mxu1 %v915_v1 }
 0x107   :  { %801 = vmatpush3.bf16.msra.mxu1 %v859_v48 }
 0x1aa   :  { %v254_v40 = vpop.f32.mrf.mxu1 }
 0x1ab   :  { %v255_v41 = vadd.f32 %v660_v39, %v254_v40 }
 0x1ac   :  { %v764_v42 = vpop.f32.mrf.mxu1 }
 0x1ad   :  { %v260_v43 = vmax.f32 %v255_v41, 0.0 }
 0x1ae   :  { %v257_v44 = vpop.f32.mrf.mxu1 }
 0x1af   :  { %v261_v45 = vpack.c.bf16 %v260_v43, %v260_v43 }
 0x1b0   :  { %v765_v46 = vpop.f32.mrf.mxu1 }
 0x1b1   :  { %783 = vmatmul.mubr.bf16.vlgmr.msra.gmra.mxu0 %v261_v45 }
 0x1b2   :  { %814 = vmatprep.mubr.msk.bf16.mxu0 %vm916_vm0, %v915_v1  ;;  %807 = vmatpush3.bf16.msra.mxu0 %v860_v49 }
 0x1b3   :  { %808 = vmatprep.subr.bf16.mxu0 %v915_v1 }
 0x1b6   :  { %809 = vmatpush3.bf16.msra.mxu0 %v861_v50 }
 0x1b7   :  { %810 = vmatprep.subr.bf16.mxu0 %v915_v1 }
 0x1ba   :  { %811 = vmatpush3.bf16.msra.mxu0 %v862_v59 }
 0x1bb   :  { %812 = vmatprep.subr.bf16.mxu0 %v915_v1 }
 0x1be   :  { %813 = vmatpush3.bf16.msra.mxu0 %v863_v60 }
 0x1bf   :  { %818 = vmatprep.subr.bf16.mxu0 %v915_v1 }
 0x271   :  { %v367_v52 = vpop.f32.mrf.mxu0 }
 0x272   :  { %v368_v53 = vadd.f32 %v669_v51, %v367_v52 }
 0x273   :  { %v784_v54 = vpop.f32.mrf.mxu0 }
 0x274   :  { %v373_v55 = vmax.f32 %v368_v53, 0.0 }
 0x275   :  { %v370_v56 = vpop.f32.mrf.mxu0 }
 0x276   :  { %v374_v57 = vpack.c.bf16 %v373_v55, %v373_v55 }
 0x277   :  { %v785_v58 = vpop.f32.mrf.mxu0 }
 0x278   :  { %803 = vmatmul.mubr.bf16.vlgmr.msra.gmra.mxu1 %v374_v57 }
 0x338   :  { %v480_v62 = vpop.f32.mrf.mxu1 }
 0x339   :  { %v481_v63 = vadd.f32 %v678_v61, %v480_v62 }
 0x33a   :  { %v804_v0 = vpop.f32.mrf.mxu1 }
 0x33b   :  { %v486_v2 = vmax.f32 %v481_v63, 0.0 }
 0x33c   :  { %v483_v3 = vpop.f32.mrf.mxu1 }
 0x33d   :  { %v487_v4 = vpack.c.bf16 %v486_v2, %v486_v2 }
 0x33e   :  { %v805_v5 = vpop.f32.mrf.mxu1 }
 0x33f   :  { %815 = vmatmul.mubr.msk.bf16.vlgmr.msra.gmra.mxu0 %vm527_vm3, %v487_v4 }
 0x340   :  { %820 = vmatprep.mubr.msk.bf16.mxu0 %vm916_vm0, %v915_v1  ;;  %v573_v1 = vld [vmem:[%s1159_s11] sm:$0x1]  ;;  %s888_s11 = scalar_lea.vmem %s646_s5, 16 }
 0x341   :  { %p889_p5 = scmp.ne.s32.totalorder %s646_s5, %s888_s11  ;;  %p894_p7 = scmp.lt.s32.totalorder %s892_s1, %s888_s11 }
 0x343   :  { %p895_p8 = por %p894_p7, %p893_p6 }
 0x345   :  { %p896_p9 = pnand %p895_p8, %p889_p5 }
 0x3ff   :  { %v565_v9 = vpop.f32.mrf.mxu0 }
 0x400   :  { %v566_v10 = vadd.f32 %v687_v8, %v565_v9 }
 0x401   :  { %v816_v11 = vpop.f32.mrf.mxu0 }
 0x402   :  { %v571_v12 = vmax.f32 %v566_v10, 0.0 }
 0x403   :  { %v568_v13 = vpop.f32.mrf.mxu0 }
 0x404   :  { %v572_v14 = vpack.c.bf16 %v571_v12, %v571_v12 }
 0x405   :  { %v817_v15 = vpop.f32.mrf.mxu0 }
 0x406   :  { %v589_v16 = vsel %vm584_vm4, %v572_v14, 0 }
 0x407   :  { %819 = vmatpush3.bf16.xpose.msra.mxu0 %v589_v16 }
 0x40e   :  { %821 = vmatmul.mubr.msk.bf16.vlgmr.msra.gmra.mxu0 %vm584_vm4, %v573_v1 }
 0x4ce   :  { %v625_v22 = vpop.f32.mrf.mxu0 }
 0x4cf   :  { %v626_v23 = vadd.f32 %v625_v22, %v583_v21 }
 0x4d0   :  { %v822_v24 = vpop.f32.mrf.mxu0 }
 0x4d1   :  { %v694_v25 = vmul.f32 -1.442695, %v626_v23 }
 0x4d2   :  { %v628_v26 = vpop.f32.mrf.mxu0 }
 0x4d3   :  { %864 = vpow2.f32 %v694_v25 }
 0x4d4   :  { %v823_v27 = vpop.f32.mrf.mxu0 }
 0x4e0   :  { %v865_v28 = vpop.eup %864 }
 0x4e1   :  { %v634_v29 = vadd.f32 1.0, %v865_v28 }
 0x4e3   :  { %866 = vrcp.f32 %v634_v29 }
 0x4f0   :  { %v867_v30 = vpop.eup %866 }
 0x4f1   :  { %638 = vst.msk [vmem:[#allocation6] sm:$0x1] %vm637_vm5, %v867_v30 }
 0x4f2   :  { %899 = shalt.err (!%p896_p9)
}
 0x4f3   :  { %648 = dma.vmem_to_hbm [thread:$0]  %s646_s5, 16, %s1161_s13, [#allocation5]  }
 0x4f4   :  { %910 = dma.done.wait [#allocation5], 16  }
 0x4f5   :  { %911 = vsyncadd [#allocation5], 4294967280 }
 0x4f6   :  { %652 = vsyncpa [#allocation4], 1 }
 0x4f7   :  { %653 = vsyncpa [#allocation5], 1 }

</bundles_post_ra>
